<compile_context>
chip_gen: v6e
topology: v6e:2x2x1
jax: 0.10.0
libtpu: 0.0.40
codegen_flags: <defaults>
</compile_context>

<pallas_src>
import functools

import jax
import jax.numpy as jnp
from jax.experimental import pallas as pl
from jax.experimental.pallas import tpu as pltpu

_LANE = 128
_SUBLANE = 8
_NEG_LARGE = -1e30  # padding bias: padded logit lanes vanish from log-softmax


def _fused_mlp_kernel(*refs, num_layers):
    """refs = (x_ref, W0, b0, W1, b1, ..., W_{L-1}, b_{L-1}, o_ref)."""
    x_ref = refs[0]
    o_ref = refs[-1]
    y = x_ref[...]                                    # (TB, in_dim), compute dtype
    for i in range(num_layers):
        w_ref = refs[1 + 2 * i]                       # (d_in, d_out), compute dtype
        b_ref = refs[2 + 2 * i]                       # (1, d_out), f32
        h = jnp.dot(y, w_ref[...], preferred_element_type=jnp.float32)
        h = h + b_ref[...]
        if i != num_layers - 1:
            y = jnp.maximum(h, 0.0).astype(w_ref.dtype)   # ReLU, back to MXU dtype
        else:                                              # log-softmax over features
            m = jnp.max(h, axis=-1, keepdims=True)
            z = h - m
            lse = jnp.log(jnp.sum(jnp.exp(z), axis=-1, keepdims=True))
            o_ref[...] = (z - lse).astype(o_ref.dtype)


def _round_up(x, m):
    return ((x + m - 1) // m) * m


def _pick_batch_tile(batch, in_dim, out_pad, x_itemsize):
    """Sublane-aligned batch tile: prefer >=2 grid steps (v7x megacore) and keep
    the double-buffered activation tiles well under the v7x scoped-VMEM default."""
    budget = 20 * 1024 * 1024
    def tile_bytes(t):
        return 2 * t * in_dim * x_itemsize + 2 * t * out_pad * 4
    tile = 256
    while tile > _SUBLANE and (pl.cdiv(batch, tile) < 2 or tile_bytes(tile) > budget):
        tile //= 2
    return max(_SUBLANE, tile)


def svd_fc_forward(x, params, compute_dtype=jnp.bfloat16):
    """Fused forward: act_i((x @ U_i @ diag(|S_i|) @ V_i) + b_i), last = LogSoftmax."""
    B, in_dim = x.shape
    num_layers = len(params)
    out_dim = params[-1][2].shape[1]
    out_pad = _round_up(out_dim, _LANE)

    # Collapse each layer into a dense weight (exactly U @ diag(|S|) @ V) and
    # cast to the MXU compute dtype.  Biases stay f32 (added post-accumulation).
    Ws, bs = [], []
    for i, (U, S, V, b) in enumerate(params):
        W = (U * jnp.abs(S)[None, :]) @ V
        b2 = b.reshape(1, -1).astype(jnp.float32)
        if i == num_layers - 1 and out_pad != out_dim:
            W = jnp.pad(W, ((0, 0), (0, out_pad - out_dim)))
            b2 = jnp.pad(b2, ((0, 0), (0, out_pad - out_dim)),
                         constant_values=_NEG_LARGE)
        Ws.append(W.astype(compute_dtype))
        bs.append(b2)

    x_itemsize = jnp.dtype(compute_dtype).itemsize
    batch_tile = _pick_batch_tile(B, in_dim, out_pad, x_itemsize)
    b_pad = _round_up(B, batch_tile)
    xc = x.astype(compute_dtype)
    if b_pad != B:
        xc = jnp.pad(xc, ((0, b_pad - B), (0, 0)))

    in_specs = [pl.BlockSpec((batch_tile, in_dim), lambda i: (i, 0))]
    operands = [xc]
    for W, b2 in zip(Ws, bs):
        in_specs.append(pl.BlockSpec(W.shape, lambda i: (0, 0)))   # full-array, VMEM-resident
        in_specs.append(pl.BlockSpec(b2.shape, lambda i: (0, 0)))
        operands.extend([W, b2])
    out_specs = pl.BlockSpec((batch_tile, out_pad), lambda i: (i, 0))

    # Raise scoped VMEM only if the (double-buffered tiles + weights) estimate
    # exceeds the smallest default (32 MiB); cap at 64 MiB (v7x physical).
    w_bytes = sum(w.size * w.dtype.itemsize + b2.size * b2.dtype.itemsize
                  for w, b2 in zip(Ws, bs))
    est = (2 * batch_tile * in_dim * x_itemsize
           + 2 * batch_tile * out_pad * 4
           + 2 * w_bytes)
    vmem_limit = None
    if est > 24 * 1024 * 1024:
        vmem_limit = min(int(est * 1.25), 64 * 1024 * 1024)

    kernel = functools.partial(_fused_mlp_kernel, num_layers=num_layers)
    out = pl.pallas_call(
        kernel,
        out_shape=jax.ShapeDtypeStruct((b_pad, out_pad), jnp.float32),
        grid_spec=pl.GridSpec(
            grid=(b_pad // batch_tile,),
            in_specs=in_specs,
            out_specs=out_specs,
        ),
        compiler_params=pltpu.CompilerParams(
            dimension_semantics=("parallel",),
            vmem_limit_bytes=vmem_limit,
        ),
    )(*operands)
    return out[:B, :out_dim]


def init_svd_fc_params(key, layer_dims):
    """Params matching SVD_FCModel.__init__ (xavier_normal U/V, uniform[0,1) S,
    zero biases)."""
    params = []
    for i in range(len(layer_dims) - 1):
        d_in, d_out = layer_dims[i], layer_dims[i + 1]
        r = min(d_in, d_out)
        key, ku, kv, ks = jax.random.split(key, 4)
        std_u = (2.0 / (d_in + r)) ** 0.5
        std_v = (2.0 / (r + d_out)) ** 0.5
        U = std_u * jax.random.normal(ku, (d_in, r), dtype=jnp.float32)
        V = std_v * jax.random.normal(kv, (r, d_out), dtype=jnp.float32)
        S = jax.random.uniform(ks, (r,), dtype=jnp.float32)
        b = jnp.zeros((d_out,), dtype=jnp.float32)
        params.append((U, S, V, b))
    return params


def _reference_factorized_f32(x, params):
    """Exact module semantics, full-precision f32 matmuls."""
    hi = jax.lax.Precision.HIGHEST
    y = x
    n = len(params)
    for i, (U, S, V, b) in enumerate(params):
        y = jnp.dot(y, U, precision=hi) * jnp.abs(S)
        y = jnp.dot(y, V, precision=hi) + b
        y = jnp.maximum(y, 0.0) if i != n - 1 else jax.nn.log_softmax(y, axis=1)
    return y


def _reference_matched(x, params, compute_dtype):
    """Same numeric recipe as the kernel (collapsed W, compute-dtype matmul
    inputs, f32 accumulation) — for a tight, precision-matched check."""
    y = x.astype(compute_dtype)
    n = len(params)
    for i, (U, S, V, b) in enumerate(params):
        W = ((U * jnp.abs(S)[None, :]) @ V).astype(compute_dtype)
        h = jnp.dot(y, W, preferred_element_type=jnp.float32) + b
        if i != n - 1:
            y = jnp.maximum(h, 0.0).astype(compute_dtype)
        else:
            y = jax.nn.log_softmax(h, axis=1)
    return y


if __name__ == "__main__":
    # Small shapes consistent with the MLP structure (input -> hidden -> out),
    # analogous to [784, 300, 100, 10] at MNIST scale.
    batch = 32
    layer_dims = [128, 64, 32, 16]

    key = jax.random.PRNGKey(0)
    key, kx = jax.random.split(key)
    x = jax.random.normal(kx, (batch, layer_dims[0]), dtype=jnp.float32)
    params = init_svd_fc_params(key, layer_dims)

    fwd = jax.jit(svd_fc_forward, static_argnames=("compute_dtype",))

    ref_f32 = _reference_factorized_f32(x, params)

    # bf16 compute path (default; fast MXU path on v6e/v7x, fine on v5e).
    out_bf16 = jax.block_until_ready(fwd(x, params, compute_dtype=jnp.bfloat16))
    assert out_bf16.shape == (batch, layer_dims[-1])
    ref_bf16 = _reference_matched(x, params, jnp.bfloat16)
    assert jnp.allclose(out_bf16, ref_bf16, atol=2e-3, rtol=2e-3)      # precision-matched
    assert jnp.allclose(out_bf16, ref_f32, atol=3e-2, rtol=3e-2)       # end-to-end fidelity

    # f32 compute path (exercised for completeness).
    out_f32 = jax.block_until_ready(fwd(x, params, compute_dtype=jnp.float32))
    assert out_f32.shape == (batch, layer_dims[-1])
    assert jnp.allclose(out_f32, ref_f32, atol=3e-2, rtol=3e-2)

    assert bool(jnp.all(jnp.isfinite(out_bf16))) and bool(jnp.all(jnp.isfinite(out_f32)))
    print("KERNEL_OK")
</pallas_src>

<mosaic_0001>
module attributes {stable_mosaic.version = 11 : i64} {
  func.func @_fused_mlp_kernel(%arg0: i32, %arg1: memref<16x128xbf16, #tpu.memory_space<vmem>>, %arg2: memref<128x64xbf16, #tpu.memory_space<vmem>>, %arg3: memref<1x64xf32, #tpu.memory_space<vmem>>, %arg4: memref<64x32xbf16, #tpu.memory_space<vmem>>, %arg5: memref<1x32xf32, #tpu.memory_space<vmem>>, %arg6: memref<32x128xbf16, #tpu.memory_space<vmem>>, %arg7: memref<1x128xf32, #tpu.memory_space<vmem>>, %arg8: memref<16x128xf32, #tpu.memory_space<vmem>>) attributes {dimension_semantics = [#tpu.dimension_semantics<parallel>], iteration_bounds = array<i64: 2>, scalar_prefetch = 0 : i64, scratch_operands = 0 : i64, tpu.core_type = #tpu.core_type<tc>, window_params = [{transform_indices = @transform_0, window_bounds = array<i64: 16, 128>}, {pipeline_mode = #tpu.pipeline_mode<synchronous>, transform_indices = @transform_1, window_bounds = array<i64: 128, 64>}, {pipeline_mode = #tpu.pipeline_mode<synchronous>, transform_indices = @transform_2, window_bounds = array<i64: 1, 64>}, {pipeline_mode = #tpu.pipeline_mode<synchronous>, transform_indices = @transform_3, window_bounds = array<i64: 64, 32>}, {pipeline_mode = #tpu.pipeline_mode<synchronous>, transform_indices = @transform_4, window_bounds = array<i64: 1, 32>}, {pipeline_mode = #tpu.pipeline_mode<synchronous>, transform_indices = @transform_5, window_bounds = array<i64: 32, 128>}, {pipeline_mode = #tpu.pipeline_mode<synchronous>, transform_indices = @transform_6, window_bounds = array<i64: 1, 128>}, {transform_indices = @transform_7, window_bounds = array<i64: 16, 128>}]} {
    %c0 = arith.constant 0 : index
    %c0_0 = arith.constant 0 : index
    %0 = vector.load %arg1[%c0, %c0_0] : memref<16x128xbf16, #tpu.memory_space<vmem>>, vector<16x128xbf16>
    %c0_1 = arith.constant 0 : index
    %c0_2 = arith.constant 0 : index
    %1 = vector.load %arg2[%c0_1, %c0_2] : memref<128x64xbf16, #tpu.memory_space<vmem>>, vector<128x64xbf16>
    %cst = arith.constant dense<0.000000e+00> : vector<16x64xf32>
    %2 = tpu.matmul %0, %1, %cst {dimension_numbers = #tpu.dot_dimension_numbers<[1], [0], [0], [1], [0, 0, 1, 1], [], []>} : vector<16x128xbf16>, vector<128x64xbf16>, vector<16x64xf32> -> vector<16x64xf32>
    %c0_3 = arith.constant 0 : index
    %c0_4 = arith.constant 0 : index
    %3 = vector.load %arg3[%c0_3, %c0_4] : memref<1x64xf32, #tpu.memory_space<vmem>>, vector<1x64xf32>
    %4 = vector.broadcast %3 : vector<1x64xf32> to vector<16x64xf32>
    %5 = arith.addf %2, %4 : vector<16x64xf32>
    %cst_5 = arith.constant 0.000000e+00 : f32
    %6 = vector.broadcast %cst_5 : f32 to vector<16x64xf32>
    %7 = arith.maximumf %5, %6 : vector<16x64xf32>
    %8 = arith.truncf %7 : vector<16x64xf32> to vector<16x64xbf16>
    %c0_6 = arith.constant 0 : index
    %c0_7 = arith.constant 0 : index
    %9 = vector.load %arg4[%c0_6, %c0_7] : memref<64x32xbf16, #tpu.memory_space<vmem>>, vector<64x32xbf16>
    %cst_8 = arith.constant dense<0.000000e+00> : vector<16x32xf32>
    %10 = tpu.matmul %8, %9, %cst_8 {dimension_numbers = #tpu.dot_dimension_numbers<[1], [0], [0], [1], [0, 0, 1, 1], [], []>} : vector<16x64xbf16>, vector<64x32xbf16>, vector<16x32xf32> -> vector<16x32xf32>
    %c0_9 = arith.constant 0 : index
    %c0_10 = arith.constant 0 : index
    %11 = vector.load %arg5[%c0_9, %c0_10] : memref<1x32xf32, #tpu.memory_space<vmem>>, vector<1x32xf32>
    %12 = vector.broadcast %11 : vector<1x32xf32> to vector<16x32xf32>
    %13 = arith.addf %10, %12 : vector<16x32xf32>
    %cst_11 = arith.constant 0.000000e+00 : f32
    %14 = vector.broadcast %cst_11 : f32 to vector<16x32xf32>
    %15 = arith.maximumf %13, %14 : vector<16x32xf32>
    %16 = arith.truncf %15 : vector<16x32xf32> to vector<16x32xbf16>
    %c0_12 = arith.constant 0 : index
    %c0_13 = arith.constant 0 : index
    %17 = vector.load %arg6[%c0_12, %c0_13] : memref<32x128xbf16, #tpu.memory_space<vmem>>, vector<32x128xbf16>
    %cst_14 = arith.constant dense<0.000000e+00> : vector<16x128xf32>
    %18 = tpu.matmul %16, %17, %cst_14 {dimension_numbers = #tpu.dot_dimension_numbers<[1], [0], [0], [1], [0, 0, 1, 1], [], []>} : vector<16x32xbf16>, vector<32x128xbf16>, vector<16x128xf32> -> vector<16x128xf32>
    %c0_15 = arith.constant 0 : index
    %c0_16 = arith.constant 0 : index
    %19 = vector.load %arg7[%c0_15, %c0_16] : memref<1x128xf32, #tpu.memory_space<vmem>>, vector<1x128xf32>
    %20 = vector.broadcast %19 : vector<1x128xf32> to vector<16x128xf32>
    %21 = arith.addf %18, %20 : vector<16x128xf32>
    %cst_17 = arith.constant dense<0xFF800000> : vector<16xf32>
    %22 = vector.multi_reduction <maximumf>, %21, %cst_17 [1] : vector<16x128xf32> to vector<16xf32>
    %23 = vector.shape_cast %22 : vector<16xf32> to vector<16x1xf32>
    %24 = vector.broadcast %23 : vector<16x1xf32> to vector<16x128xf32>
    %25 = arith.subf %21, %24 : vector<16x128xf32>
    %26 = math.exp %25 : vector<16x128xf32>
    %cst_18 = arith.constant dense<0.000000e+00> : vector<16xf32>
    %27 = vector.multi_reduction <add>, %26, %cst_18 [1] : vector<16x128xf32> to vector<16xf32>
    %28 = vector.shape_cast %27 : vector<16xf32> to vector<16x1xf32>
    %29 = math.log %28 : vector<16x1xf32>
    %30 = vector.broadcast %29 : vector<16x1xf32> to vector<16x128xf32>
    %31 = arith.subf %25, %30 : vector<16x128xf32>
    %c0_19 = arith.constant 0 : index
    %c0_20 = arith.constant 0 : index
    %32 = vector.load %arg8[%c0_19, %c0_20] : memref<16x128xf32, #tpu.memory_space<vmem>>, vector<16x128xf32>
    tpu.vector_store %arg8[%c0_19, %c0_20], %31 {strides = array<i32>} : memref<16x128xf32, #tpu.memory_space<vmem>>, vector<16x128xf32>,
    return
  }
  func.func @transform_0(%arg0: i32) -> (i32, i32) {
    %c0_i32 = arith.constant 0 : i32
    %c0_i32_0 = arith.constant 0 : i32
    return %arg0, %c0_i32 : i32, i32
  }
  func.func @transform_1(%arg0: i32) -> (i32, i32) {
    %c0_i32 = arith.constant 0 : i32
    %c0_i32_0 = arith.constant 0 : i32
    %c0_i32_1 = arith.constant 0 : i32
    return %c0_i32, %c0_i32_0 : i32, i32
  }
  func.func @transform_2(%arg0: i32) -> (i32, i32) {
    %c0_i32 = arith.constant 0 : i32
    %c0_i32_0 = arith.constant 0 : i32
    %c0_i32_1 = arith.constant 0 : i32
    return %c0_i32, %c0_i32_0 : i32, i32
  }
  func.func @transform_3(%arg0: i32) -> (i32, i32) {
    %c0_i32 = arith.constant 0 : i32
    %c0_i32_0 = arith.constant 0 : i32
    %c0_i32_1 = arith.constant 0 : i32
    return %c0_i32, %c0_i32_0 : i32, i32
  }
  func.func @transform_4(%arg0: i32) -> (i32, i32) {
    %c0_i32 = arith.constant 0 : i32
    %c0_i32_0 = arith.constant 0 : i32
    %c0_i32_1 = arith.constant 0 : i32
    return %c0_i32, %c0_i32_0 : i32, i32
  }
  func.func @transform_5(%arg0: i32) -> (i32, i32) {
    %c0_i32 = arith.constant 0 : i32
    %c0_i32_0 = arith.constant 0 : i32
    %c0_i32_1 = arith.constant 0 : i32
    return %c0_i32, %c0_i32_0 : i32, i32
  }
  func.func @transform_6(%arg0: i32) -> (i32, i32) {
    %c0_i32 = arith.constant 0 : i32
    %c0_i32_0 = arith.constant 0 : i32
    %c0_i32_1 = arith.constant 0 : i32
    return %c0_i32, %c0_i32_0 : i32, i32
  }
  func.func @transform_7(%arg0: i32) -> (i32, i32) {
    %c0_i32 = arith.constant 0 : i32
    %c0_i32_0 = arith.constant 0 : i32
    return %arg0, %c0_i32 : i32, i32
  }
}

</mosaic_0001>

<bundles_post_ra>
// kernel: svd_fc_forward.1
= control target key start
LH: loop header
LB: loop body
LE: loop exit
PB: predicated region body
PF: predicated region fallthrough
CT: control target
= control target key end

     0   :  { %s810_s24 = smov 0   ;;  %s885_s0 = inlined_call_operand.vmem [shape: bf16[32,128], index: 0, kind: input, shape index: {}]   ;;  %s886_s1 = inlined_call_operand.vmem [shape: bf16[128,64], index: 1, kind: input, shape index: {}]   ;;  %s887_s2 = inlined_call_operand.vmem [shape: f32[1,64], index: 2, kind: input, shape index: {}]   ;;  %s888_s3 = inlined_call_operand.vmem [shape: bf16[64,32], index: 3, kind: input, shape index: {}]   ;;  %s889_s4 = inlined_call_operand.vmem [shape: f32[1,32], index: 4, kind: input, shape index: {}]   ;;  %s890_s5 = inlined_call_operand.vmem [shape: bf16[32,128], index: 5, kind: input, shape index: {}]   ;;  %s891_s6 = inlined_call_operand.vmem [shape: f32[1,128], index: 6, kind: input, shape index: {}]   ;;  %s892_s7 = inlined_call_operand.vmem [shape: f32[32,128], index: 7, kind: output, shape index: {}]  }
   0x1 LB: > { %s639_s25 = sadd.s32 4294967295, %s766_s24   ;;  %p643_p0 = scmp.ge.s32.totalorder %s766_s24, 1  ;;  %s766_s24 = sphi %s810_s24, %s17_s24  }
   0x2   : > { %p238_p1 = scmp.lt.s32.totalorder %s766_s24, 3 }
   0x4   : > { %p239_p2 = pnand %p643_p0, %p238_p1 }
   0x5   : > { %s644_s30 = sshll.u32 (!%p239_p2), %s639_s25, 1 }
   0x6   : > { %242 = sbr.rel (%p239_p2) target bundleno = 962 (0x3c2), region = 48  ;;  %p271_p3 = scmp.lt.s32.totalorder (!%p239_p2), %s644_s30, 3 }
   0xb   : > { %v737_v0 = vld [vmem:[%s886_s1 + $0x38] sm:$0xff]   ;;  %v768_v1 = vmov 0.0   ;;  %v738_v2 = vld [vmem:[%s886_s1 + $0x30] sm:$0xff]   ;;  %vm769_vm0 = vmmov 0   ;;  %s894_s30 = smov (!%p271_p3, %s644_s30), 3  ;;  %v739_v3 = vld [vmem:[%s886_s1 + $0x28] sm:$0xff]  }
   0xc   : > { %687 = vmatprep.subr.bf16.mxu0 %v768_v1  ;;  %707 = vmatprep.subr.bf16.mxu1 %v768_v1  ;;  %s645_s10 = sshll.u32 %s894_s30, 2  ;;  %v746_v4 = vld [vmem:[%s888_s3 + $0x18] sm:$0xff]   ;;  %v740_v5 = vld [vmem:[%s886_s1 + $0x20] sm:$0xff]   ;;  %v742_v7 = vld [vmem:[%s886_s1 + $0x10] sm:$0xff]   ;;  %vm445_vm1 = vcmask 523264   ;;  %vm516_vm2 = vcmask 261120  }
   0xd   : > { %688 = vmatpush3.bf16.msra.mxu0 %v737_v0  ;;  %703 = vmatprep.mubr.msk.bf16.mxu0 %vm769_vm0, %v768_v1  ;;  %s274_s13 = scalar_lea.vmem %s885_s0, %s645_s10  ;;  %v741_v6 = vld [vmem:[%s886_s1 + $0x18] sm:$0xff]   ;;  %v743_v8 = vld [vmem:[%s886_s1 + $0x8] sm:$0xff]   ;;  %v744_v9 = vld [vmem:[%s886_s1] sm:$0xff]   ;;  %s647_s21 = sshll.u32 %s894_s30, 3 }
   0xe   : > { %689 = vmatprep.subr.bf16.mxu0 %v768_v1  ;;  %715 = vmatprep.mubr.msk.bf16.mxu1 %vm769_vm0, %v768_v1  ;;  %v745_v10 = vld [vmem:[%s274_s13] sm:$0xff]   ;;  %v747_v11 = vld [vmem:[%s888_s3 + $0x10] sm:$0xff]   ;;  %v748_v12 = vld [vmem:[%s888_s3 + $0x8] sm:$0xff]   ;;  %s280_s25 = scalar_lea.vmem %s892_s7, %s647_s21 }
   0xf   : > { %708 = vmatpush3.bf16.msra.mxu1 %v746_v4  ;;  %v749_v13 = vld [vmem:[%s888_s3] sm:$0xff]   ;;  %v750_v24 = vld [vmem:[%s890_s5 + $0x8] sm:$0xff]  }
  0x10   : > { %709 = vmatprep.subr.bf16.mxu1 %v768_v1  ;;  %v648_v14 = vld [vmem:[%s887_s2] ss:$0 sm:$0xff] }
  0x11   : > { %690 = vmatpush3.bf16.msra.mxu0 %v738_v2  ;;  %v751_v25 = vld [vmem:[%s890_s5] sm:$0xff]  }
  0x12   : > { %691 = vmatprep.subr.bf16.mxu0 %v768_v1  ;;  %v658_v26 = vld [vmem:[%s889_s4] ss:$0 sm:$0xff] }
  0x13   : > { %710 = vmatpush3.bf16.msra.mxu1 %v747_v11  ;;  %v664_v36 = vld [vmem:[%s891_s6] ss:$0 sm:$0xff] }
  0x14   : > { %711 = vmatprep.subr.bf16.mxu1 %v768_v1 }
  0x15   : > { %692 = vmatpush3.bf16.msra.mxu0 %v739_v3 }
  0x16   : > { %693 = vmatprep.subr.bf16.mxu0 %v768_v1 }
  0x17   : > { %712 = vmatpush3.bf16.msra.mxu1 %v748_v12 }
  0x18   : > { %713 = vmatprep.subr.bf16.mxu1 %v768_v1 }
  0x19   : > { %694 = vmatpush3.bf16.msra.mxu0 %v740_v5 }
  0x1a   : > { %695 = vmatprep.subr.bf16.mxu0 %v768_v1 }
  0x1b   : > { %714 = vmatpush3.bf16.msra.mxu1 %v749_v13 }
  0x1c   : > { %719 = vmatprep.subr.bf16.mxu1 %v768_v1 }
  0x1d   : > { %696 = vmatpush3.bf16.msra.mxu0 %v741_v6 }
  0x1e   : > { %697 = vmatprep.subr.bf16.mxu0 %v768_v1 }
  0x21   : > { %698 = vmatpush3.bf16.msra.mxu0 %v742_v7 }
  0x22   : > { %699 = vmatprep.subr.bf16.mxu0 %v768_v1 }
  0x25   : > { %700 = vmatpush3.bf16.msra.mxu0 %v743_v8 }
  0x26   : > { %701 = vmatprep.subr.bf16.mxu0 %v768_v1 }
  0x29   : > { %702 = vmatpush3.bf16.msra.mxu0 %v744_v9 }
  0x2c   : > { %704 = vmatmul.mubr.bf16.vlgmr.msra.gmra.mxu0 %v745_v10 }
  0xec   : > { %v396_v15 = vpop.f32.mrf.mxu0 }
  0xed   : > { %v397_v17 = vadd.f32 %v648_v14, %v396_v15 }
  0xee   : > { %v705_v16 = vpop.f32.mrf.mxu0 }
  0xef   : > { %v403_v21 = vmax.f32 %v397_v17, 0.0 }
  0xf0   : > { %v399_v18 = vpop.f32.mrf.mxu0 }
  0xf1   : > { %v400_v19 = vadd.f32 %v648_v14, %v399_v18 }
  0xf2   : > { %v706_v20 = vpop.f32.mrf.mxu0 }
  0xf3   : > { %v404_v22 = vmax.f32 %v400_v19, 0.0 }
  0xf5   : > { %v405_v23 = vpack.c.bf16 %v404_v22, %v403_v21 }
  0xf7   : > { %716 = vmatmul.mubr.msk.bf16.vlgmr.msra.gmra.mxu1 %vm445_vm1, %v405_v23 }
  0xf8   : > { %723 = vmatprep.mubr.msk.bf16.mxu1 %vm769_vm0, %v768_v1  ;;  %720 = vmatpush3.bf16.msra.mxu1 %v750_v24 }
  0xf9   : > { %721 = vmatprep.subr.bf16.mxu1 %v768_v1 }
  0xfc   : > { %722 = vmatpush3.bf16.msra.mxu1 %v751_v25 }
 0x1b7   : > { %v483_v27 = vpop.f32.mrf.mxu1 }
 0x1b8   : > { %v484_v29 = vadd.f32 %v658_v26, %v483_v27 }
 0x1b9   : > { %v717_v28 = vpop.f32.mrf.mxu1 }
 0x1ba   : > { %v490_v33 = vmax.f32 %v484_v29, 0.0 }
 0x1bb   : > { %v486_v30 = vpop.f32.mrf.mxu1 }
 0x1bc   : > { %v487_v31 = vadd.f32 %v658_v26, %v486_v30 }
 0x1bd   : > { %v718_v32 = vpop.f32.mrf.mxu1 }
 0x1be   : > { %v491_v34 = vmax.f32 %v487_v31, 0.0 }
 0x1c0   : > { %v492_v35 = vpack.c.bf16 %v491_v34, %v490_v33 }
 0x1c2   : > { %724 = vmatmul.mubr.msk.bf16.vlgmr.msra.gmra.mxu1 %vm516_vm2, %v492_v35 }
 0x282   : > { %v554_v37 = vpop.f32.mrf.mxu1 }
 0x283   : > { %v555_v38 = vadd.f32 %v664_v36, %v554_v37 }
 0x284   : > { %v725_v39 = vpop.f32.mrf.mxu1 }
 0x285   : > { %561 = vmax.xlane.f32.xlu0 %v555_v38 }
 0x286   : > { %v557_v40 = vpop.f32.mrf.mxu1 }
 0x287   : > { %v558_v41 = vadd.f32 %v664_v36, %v557_v40 }
 0x288   : > { %v726_v42 = vpop.f32.mrf.mxu1 }
 0x289   : > { %563 = vmax.xlane.f32.xlu0 %v558_v41 }
 0x30e   : > { %v562_v43 = vpop.xlane.xlu0 %561 }
 0x30f   : > { %v565_v44 = vsub.f32 %v555_v38, %v562_v43 }
 0x311   : > { %v567_v45 = vmul.f32 1.442695, %v565_v44 }
 0x312   : > { %v564_v46 = vpop.xlane.xlu0 %563 }
 0x313   : > { %v566_v47 = vsub.f32 %v558_v41, %v564_v46  ;;  %752 = vpow2.f32 %v567_v45 }
 0x315   : > { %v569_v48 = vmul.f32 1.442695, %v566_v47 }
 0x317   : > { %754 = vpow2.f32 %v569_v48 }
 0x320   : > { %v753_v49 = vpop.eup %752 }
 0x321   : > { %571 = vadd.xlane.f32.xlu1 %v753_v49 }
 0x324   : > { %v755_v50 = vpop.eup %754 }
 0x325   : > { %573 = vadd.xlane.f32.xlu1 %v755_v50 }
 0x3aa   : > { %v572_v51 = vpop.xlane.xlu1 %571 }
 0x3ab   : > { %756 = vlog2.f32 %v572_v51 }
 0x3ae   : > { %v574_v52 = vpop.xlane.xlu1 %573 }
 0x3af   : > { %758 = vlog2.f32 %v574_v52 }
 0x3b8   : > { %v757_v53 = vpop.eup %756 }
 0x3b9   : > { %v576_v54 = vmul.f32 0.6931472, %v757_v53 }
 0x3bb   : > { %v579_v55 = vsub.f32 %v565_v44, %v576_v54 }
 0x3bc   : > { %v759_v56 = vpop.eup %758 }
 0x3bd   : > { %581 = vst [vmem:[%s280_s25] sm:$0xff] %v579_v55  ;;  %v578_v57 = vmul.f32 0.6931472, %v759_v56 }
 0x3bf   : > { %v580_v58 = vsub.f32 %v566_v47, %v578_v57 }
 0x3c1   : > { %582 = vst [vmem:[%s280_s25 + $0x8] sm:$0xff] %v580_v58 }
 0x3c2 PF: > { %s17_s24 = sadd.s32 1, %s766_s24  }
 0x3c3   : > { %p14_p4 = scmp.ge.s32.totalorder %s17_s24, 4  }
 0x3c5   :  { %16 = sbr.rel (!%p14_p4) target bundleno = 1 (0x1), region = 78 }

</bundles_post_ra>
